<compile_context>
chip_gen: v5e
topology: v5e:2x2
jax: 0.10.0
libtpu: 0.0.40
codegen_flags: <defaults>
</compile_context>

<pallas_src>
import functools

import jax
import jax.numpy as jnp
from jax.experimental import pallas as pl
from jax.experimental.pallas import tpu as pltpu


SCALE = 0.003921569  # exactly what the PyTorch module multiplies by


def _nearest_indices(out_size: int, in_size: int) -> jnp.ndarray:
    # PyTorch 'nearest' (default interpolate): src = floor(dst * in / out).
    # Integer form matches for practical sizes (PyTorch uses a float scale).
    return (jnp.arange(out_size, dtype=jnp.int32) * in_size) // out_size


def _pick_h_tile(h_out: int) -> int:
    """Output-row tile: multiple of 16 (bf16 sublane packing) dividing H_out."""
    if h_out <= 256:
        return h_out
    for t in (256, 192, 128, 64, 32, 16):
        if h_out % t == 0:
            return t
    return h_out  # full-dim block is always layout-legal


def _prep_kernel_h_first(x_ref, sh_ref, swt_ref, o_ref, *, compute_dtype):
    # x_ref  : (H_in, W_in)   source plane (BGR->RGB flip done via index_map)
    # sh_ref : (tH,   H_in)   one-hot row selector tile
    # swt_ref: (W_in, W_out)  one-hot col selector, transposed
    # o_ref  : (tH,   W_out)
    x = x_ref[...].astype(compute_dtype)          # cast on VPU; DMA stays f32
    rows = jnp.dot(sh_ref[...], x, preferred_element_type=jnp.float32).astype(compute_dtype)
    out = jnp.dot(rows, swt_ref[...], preferred_element_type=jnp.float32)
    o_ref[...] = (out * SCALE).astype(o_ref.dtype)   # 1/255 in f32 (not exact in bf16)


def _prep_kernel_w_first(x_ref, sh_ref, swt_ref, o_ref, cols_ref, *, compute_dtype):
    # Column-select once per (n, c) plane into persistent VMEM scratch, then
    # each H_out tile only does the (cheap) row-select matmul.
    @pl.when(pl.program_id(2) == 0)
    def _():
        x = x_ref[...].astype(compute_dtype)
        cols_ref[...] = jnp.dot(
            x, swt_ref[...], preferred_element_type=jnp.float32
        ).astype(cols_ref.dtype)                   # gathered pixels: exact in bf16

    out = jnp.dot(sh_ref[...], cols_ref[...], preferred_element_type=jnp.float32)
    o_ref[...] = (out * SCALE).astype(o_ref.dtype)


def make_prep(input_shape, use_bf16: bool = True):
    """Returns a jitted fn x:(N, C>=3, H_in, W_in) f32 -> (N, 3, H_out, W_out) f32.

    use_bf16=True is lossless for integer-valued pixels 0..255 (the intended
    use case); pass use_bf16=False for exact f32 on arbitrary float inputs.
    """
    H_out, W_out = int(input_shape[2]), int(input_shape[3])
    compute_dtype = jnp.bfloat16 if use_bf16 else jnp.float32
    sel_bytes = 2 if use_bf16 else 4
    tH = _pick_h_tile(H_out)
    n_h_tiles = H_out // tH

    def fn(x):
        N, C, H_in, W_in = x.shape
        assert C >= 3, "forward slices channels 0..2"

        # One-hot selection matrices (0/1 is exact in bf16).
        row_idx = _nearest_indices(H_out, H_in)                                                        # (H_out,)
        col_idx = _nearest_indices(W_out, W_in)                                                        # (W_out,)
        sh = (jnp.arange(H_in, dtype=jnp.int32)[None, :] == row_idx[:, None]).astype(compute_dtype)   # (H_out, H_in)
        swt = (jnp.arange(W_in, dtype=jnp.int32)[:, None] == col_idx[None, :]).astype(compute_dtype)  # (W_in, W_out)

        # Static contraction-order choice (min FLOPs; w-first amortizes via scratch).
        flops_h_first = H_out * W_in * (H_in + W_out)
        flops_w_first = H_in * W_out * (W_in + H_out)
        w_first = flops_w_first < flops_h_first

        cols_scratch_bytes = H_in * W_out * sel_bytes if w_first else 0
        est = (2 * (H_in * W_in * 4             # x plane (f32), double-buffered
                    + tH * H_in * sel_bytes     # sh tile
                    + W_in * W_out * sel_bytes  # swt
                    + tH * W_out * 4)           # out tile (f32)
               + cols_scratch_bytes)
        vmem_limit = None
        if est > 12 * 2**20:
            # TODO(synk): on v7x (64 MiB physical VMEM) also tile W_in if this exceeds ~56 MiB.
            vmem_limit = min(int(est * 1.5) + (2 << 20), 100 * 2**20)

        in_specs = [
            # BGR->RGB flip folded into index_map: output channel c reads input 2-c.
            # Block index constant across inner h axis -> one DMA per (n, c).
            pl.BlockSpec((None, None, H_in, W_in), lambda n, c, h: (n, 2 - c, 0, 0)),
            pl.BlockSpec((tH, H_in), lambda n, c, h: (h, 0)),
            pl.BlockSpec((W_in, W_out), lambda n, c, h: (0, 0)),
        ]
        out_specs = pl.BlockSpec((None, None, tH, W_out), lambda n, c, h: (n, c, h, 0))

        if w_first:
            kernel = functools.partial(_prep_kernel_w_first, compute_dtype=compute_dtype)
            scratch_shapes = [pltpu.VMEM((H_in, W_out), compute_dtype)]
            # h axis carries the cached cols scratch -> must be "arbitrary".
            dim_sem = ("parallel", "parallel", "arbitrary")
        else:
            kernel = functools.partial(_prep_kernel_h_first, compute_dtype=compute_dtype)
            scratch_shapes = []
            dim_sem = ("parallel", "parallel", "parallel")

        return pl.pallas_call(
            kernel,
            out_shape=jax.ShapeDtypeStruct((N, 3, H_out, W_out), jnp.float32),
            grid_spec=pltpu.PrefetchScalarGridSpec(
                num_scalar_prefetch=0,
                grid=(N, 3, n_h_tiles),
                in_specs=in_specs,
                out_specs=out_specs,
                scratch_shapes=scratch_shapes,
            ),
            compiler_params=pltpu.CompilerParams(
                dimension_semantics=dim_sem,
                vmem_limit_bytes=vmem_limit,
            ),
        )(x, sh, swt)

    return jax.jit(fn)


def _reference(x, input_shape):
    """Pure-JAX reference mirroring the PyTorch forward."""
    H_out, W_out = int(input_shape[2]), int(input_shape[3])
    ri = _nearest_indices(H_out, x.shape[2])
    ci = _nearest_indices(W_out, x.shape[3])
    xr = x[:, :, ri, :][:, :, :, ci]                       # nearest resize
    xr = jnp.concatenate([xr[:, 2:3], xr[:, 1:2], xr[:, 0:1]], axis=1)
    return xr * SCALE


if __name__ == "__main__":
    key = jax.random.PRNGKey(0)

    def run_case(N, C, H_in, W_in, H_out, W_out, k):
        input_shape = (1, 3, H_out, W_out)
        # Integer-valued pixels 0..255 stored as f32 (the real use case) -> exact in bf16.
        x = jnp.floor(jax.random.uniform(k, (N, C, H_in, W_in), dtype=jnp.float32) * 256.0)
        prep = make_prep(input_shape)
        y = prep(x)
        jax.block_until_ready(y)
        y_ref = _reference(x, input_shape)
        assert y.shape == (N, 3, H_out, W_out)
        assert jnp.allclose(y, y_ref, atol=1e-6), f"mismatch for {(H_in, W_in, H_out, W_out)}"

    k0, k1, k2 = jax.random.split(key, 3)
    # h-first contraction order, single H_out tile.
    run_case(2, 4, 48, 128, 32, 128, k0)
    # w-first order (cached column-select scratch) with H_out tiled across the grid.
    run_case(2, 4, 40, 512, 288, 128, k1)
    # Odd, non-(8,128)-aligned spatial sizes (full-dim blocks keep layout legal).
    run_case(1, 3, 30, 50, 24, 96, k2)

    print("KERNEL_OK")
</pallas_src>

<mosaic_0001>
module attributes {stable_mosaic.version = 11 : i64} {
  func.func @_prep_kernel_h_first(%arg0: i32, %arg1: i32, %arg2: i32, %arg3: memref<1x1x48x128xf32, #tpu.memory_space<vmem>>, %arg4: memref<32x48xbf16, #tpu.memory_space<vmem>>, %arg5: memref<128x128xbf16, #tpu.memory_space<vmem>>, %arg6: memref<1x1x32x128xf32, #tpu.memory_space<vmem>>) attributes {dimension_semantics = [#tpu.dimension_semantics<parallel>, #tpu.dimension_semantics<parallel>, #tpu.dimension_semantics<parallel>], iteration_bounds = array<i64: 2, 3, 1>, scalar_prefetch = 0 : i64, scratch_operands = 0 : i64, tpu.core_type = #tpu.core_type<tc>, window_params = [{transform_indices = @transform_0, window_bounds = array<i64: 1, 1, 48, 128>}, {transform_indices = @transform_1, window_bounds = array<i64: 32, 48>}, {pipeline_mode = #tpu.pipeline_mode<synchronous>, transform_indices = @transform_2, window_bounds = array<i64: 128, 128>}, {transform_indices = @transform_3, window_bounds = array<i64: 1, 1, 32, 128>}]} {
    %c0 = arith.constant 0 : index
    %c0_0 = arith.constant 0 : index
    %c0_1 = arith.constant 0 : index
    %c0_2 = arith.constant 0 : index
    %0 = vector.load %arg3[%c0, %c0_0, %c0_1, %c0_2] : memref<1x1x48x128xf32, #tpu.memory_space<vmem>>, vector<1x1x48x128xf32>
    %1 = vector.shape_cast %0 : vector<1x1x48x128xf32> to vector<48x128xf32>
    %2 = arith.truncf %1 : vector<48x128xf32> to vector<48x128xbf16>
    %c0_3 = arith.constant 0 : index
    %c0_4 = arith.constant 0 : index
    %3 = vector.load %arg4[%c0_3, %c0_4] : memref<32x48xbf16, #tpu.memory_space<vmem>>, vector<32x48xbf16>
    %cst = arith.constant dense<0.000000e+00> : vector<32x128xf32>
    %4 = tpu.matmul %3, %2, %cst {dimension_numbers = #tpu.dot_dimension_numbers<[1], [0], [0], [1], [0, 0, 1, 1], [], []>} : vector<32x48xbf16>, vector<48x128xbf16>, vector<32x128xf32> -> vector<32x128xf32>
    %5 = arith.truncf %4 : vector<32x128xf32> to vector<32x128xbf16>
    %c0_5 = arith.constant 0 : index
    %c0_6 = arith.constant 0 : index
    %6 = vector.load %arg5[%c0_5, %c0_6] : memref<128x128xbf16, #tpu.memory_space<vmem>>, vector<128x128xbf16>
    %cst_7 = arith.constant dense<0.000000e+00> : vector<32x128xf32>
    %7 = tpu.matmul %5, %6, %cst_7 {dimension_numbers = #tpu.dot_dimension_numbers<[1], [0], [0], [1], [0, 0, 1, 1], [], []>} : vector<32x128xbf16>, vector<128x128xbf16>, vector<32x128xf32> -> vector<32x128xf32>
    %cst_8 = arith.constant 0.00392156886 : f32
    %8 = vector.broadcast %cst_8 : f32 to vector<32x128xf32>
    %9 = arith.mulf %7, %8 : vector<32x128xf32>
    %c0_9 = arith.constant 0 : index
    %c0_10 = arith.constant 0 : index
    %c0_11 = arith.constant 0 : index
    %c0_12 = arith.constant 0 : index
    %10 = vector.load %arg6[%c0_9, %c0_10, %c0_11, %c0_12] : memref<1x1x32x128xf32, #tpu.memory_space<vmem>>, vector<1x1x32x128xf32>
    %11 = vector.shape_cast %10 : vector<1x1x32x128xf32> to vector<32x128xf32>
    %12 = vector.shape_cast %9 : vector<32x128xf32> to vector<1x1x32x128xf32>
    tpu.vector_store %arg6[%c0_9, %c0_10, %c0_11, %c0_12], %12 {strides = array<i32>} : memref<1x1x32x128xf32, #tpu.memory_space<vmem>>, vector<1x1x32x128xf32>,
    return
  }
  func.func @transform_0(%arg0: i32, %arg1: i32, %arg2: i32) -> (i32, i32, i32, i32) {
    %c2_i32 = arith.constant 2 : i32
    %0 = arith.subi %c2_i32, %arg1 : i32
    %c0_i32 = arith.constant 0 : i32
    %c0_i32_0 = arith.constant 0 : i32
    %c0_i32_1 = arith.constant 0 : i32
    return %arg0, %0, %c0_i32, %c0_i32_0 : i32, i32, i32, i32
  }
  func.func @transform_1(%arg0: i32, %arg1: i32, %arg2: i32) -> (i32, i32) {
    %c0_i32 = arith.constant 0 : i32
    %c0_i32_0 = arith.constant 0 : i32
    return %arg2, %c0_i32 : i32, i32
  }
  func.func @transform_2(%arg0: i32, %arg1: i32, %arg2: i32) -> (i32, i32) {
    %c0_i32 = arith.constant 0 : i32
    %c0_i32_0 = arith.constant 0 : i32
    %c0_i32_1 = arith.constant 0 : i32
    return %c0_i32, %c0_i32_0 : i32, i32
  }
  func.func @transform_3(%arg0: i32, %arg1: i32, %arg2: i32) -> (i32, i32, i32, i32) {
    %c0_i32 = arith.constant 0 : i32
    %c0_i32_0 = arith.constant 0 : i32
    return %arg0, %arg1, %arg2, %c0_i32 : i32, i32, i32, i32
  }
}

</mosaic_0001>

<bundles_post_ra>
// kernel: fn.1
= control target key start
LH: loop header
LB: loop body
LE: loop exit
PB: predicated region body
PF: predicated region fallthrough
CT: control target
= control target key end

     0   :  { %8 = vsyncpa [#allocation3], 0  ;;  %s1097_s0 = inlined_call_operand.hbm [shape: f32[2,4,48,128], index: 0, kind: input, shape index: {}]   ;;  %s1098_s1 = inlined_call_operand.vmem [shape: bf16[32,48], index: 1, kind: input, shape index: {}]   ;;  %s1099_s2 = inlined_call_operand.vmem [shape: bf16[128,128], index: 2, kind: input, shape index: {}]   ;;  %s1100_s3 = inlined_call_operand.hbm [shape: f32[2,3,32,128], index: 3, kind: output, shape index: {}]  }
   0x1   :  { %10 = vsyncpa [#allocation3 + $0x1], 0 }
   0x2   :  { %11 = vsyncpa [#allocation4], 0 }
   0x3   :  { %13 = vsyncpa [#allocation4 + $0x1], 0  ;;  %s880_s12 = smov 0   ;;  %s882_s13 = smov 0  }
   0x4   :  { %s884_s14 = smov 0   ;;  %s886_s15 = smov 0  }
   0x5   :  { %s888_s16 = smov 0   ;;  %s890_s17 = smov 0  }
   0x6   :  { %s892_s18 = smov 0   ;;  %s894_s19 = smov 0  }
   0x7   :  { %s896_s20 = smov 0   ;;  %s898_s21 = smov 0  }
   0x8   :  { %s900_s22 = smov 0  }
   0x9 LB: > { %1105 = sst [smem:[#allocation8_spill]] %s834_s17  ;;  %s518_s23 = sadd.s32 4294967295, %s854_s22   ;;  %s854_s22 = sphi %s900_s22, %s19_s22   ;;  %s850_s21 = sphi %s898_s21, %s1128_s21   ;;  %s846_s20 = sphi %s896_s20, %s1120_s20   ;;  %s842_s19 = sphi %s894_s19, %s1127_s19   ;;  %s838_s18 = sphi %s892_s18, %s1119_s18   ;;  %s834_s17 = sphi %s890_s17, %s1118_s17   ;;  %s830_s16 = sphi %s888_s16, %s1126_s16   ;;  %s826_s15 = sphi %s886_s15, %s1125_s15   ;;  %s822_s14 = sphi %s884_s14, %s1124_s14   ;;  %s818_s13 = sphi %s882_s13, %s1123_s13   ;;  %s814_s12 = sphi %s880_s12, %s1122_s12  }
   0xa   : > { %1106 = sst [smem:[#allocation9_spill]] %s846_s20  ;;  %s519_s24 = sadd.s32 4294967294, %s854_s22  }
   0xb   : > { %s34_s25 = sadd.s32 1, %s846_s20  ;;  %s38_s26 = sadd.s32 1, %s850_s21 }
   0xc   : > { %p36_p0 = scmp.ge.s32.totalorder %s34_s25, 3  ;;  %s42_s27 = ssub.s32 2, %s846_s20 }
   0xd   : > { %s49_s28 = sadd.s32 1, %s834_s17  ;;  %p56_p1 = scmp.ne.s32.totalorder %s834_s17, %s830_s16 }
   0xe   : > { %s1130_s25 = smov (%p36_p0, %s34_s25), 0  ;;  %s1132_s26 = smov (!%p36_p0, %s38_s26), %s850_s21 }
   0xf   : > { %1107 = sst [smem:[#allocation10_spill]] %s1130_s25  ;;  %s43_s29 = ssub.s32 2, %s1130_s25 }
  0x10   : > { %p57_p2 = scmp.eq.s32.totalorder %s854_s22, 0  ;;  %p40_p3 = scmp.ge.s32.totalorder %s1132_s26, 2 }
  0x11   : > { %s45_s30 = ssub.s32 %s42_s27, %s43_s29  ;;  %p62_p5 = scmp.ne.s32.totalorder %s830_s16, %s826_s15 }
  0x12   : > { %p950_p4 = por %p57_p2, %p56_p1  ;;  %s1134_s26 = smov (%p40_p3, %s1132_s26), 0 }
  0x13   : > { %1109 = sst [smem:[#allocation11_spill]] %s1134_s26  ;;  %p63_p6 = scmp.eq.s32.totalorder %s518_s23, 0 }
  0x14   : > { %s120_s5 = ssub.s32 %s846_s20, %s1130_s25  ;;  %s44_s6 = ssub.s32 %s850_s21, %s1134_s26 }
  0x15   : > { %s126_s7 = sadd.s32 1, %s822_s14  ;;  %s46_s8 = sor.u32 %s45_s30, %s44_s6 }
  0x16   : > { %p965_p7 = por %p63_p6, %p62_p5  ;;  %p47_p8 = scmp.eq.s32.totalorder %s46_s8, 0 }
  0x17   : > { %s121_s10 = sor.u32 %s120_s5, %s44_s6  ;;  %p136_p10 = scmp.ne.s32.totalorder %s822_s14, %s818_s13 }
  0x18   : > { %p124_p9 = scmp.eq.s32.totalorder %s121_s10, 0  ;;  %p137_p11 = scmp.eq.s32.totalorder %s518_s23, 5 }
  0x19   : > { %s972_s11 = scalar_select %p47_p8, %s834_s17, %s49_s28  }
  0x1a   : > { %s975_s15 = scalar_select %p124_p9, %s822_s14, %s126_s7  }
  0x1b   : > { %1111 = sst [smem:[#allocation12_spill]] %s972_s11  ;;  %p142_p12 = scmp.ne.s32.totalorder %s818_s13, %s814_s12 }
  0x1c   : > { %1112 = sst [smem:[#allocation13_spill]] %s975_s15  ;;  %p143_p13 = scmp.eq.s32.totalorder %s519_s24, 5 }
  0x1d   : > { %p983_p0 = por %p137_p11, %p136_p10  ;;  %p608_p1 = scmp.lt.s32.totalorder %s854_s22, 6 }
  0x1e   : > { %p988_p2 = por %p143_p13, %p142_p12  ;;  %s175_s28 = sand.u32 1, %s834_s17  }
  0x1f   : > { %s591_s5 = smul.u32 48, %s175_s28  ;;  %p997_p3 = pnand %p608_p1, %p950_p4 }
  0x20   : > { %s592_s6 = smul.u32 6, %s42_s27  ;;  %p524_p5 = scmp.ge.s32.totalorder %s854_s22, 1 }
  0x21   : > { %s593_s24 = smul.u32 24, %s850_s21  ;;  %s179_s7 = scalar_lea.vmem [#allocation2], %s591_s5 }
  0x22   : > { %s190_s8 = sshll.u32 %s179_s7, 4  ;;  %p198_p6 = scmp.lt.s32.totalorder %s854_s22, 7  ;;  %s191_s8 = int_to_ptr.vmem [resolvable:$true] %s190_s8 }
  0x23   : > { %s185_s10 = sadd.s32 %s593_s24, %s592_s6  ;;  %s176_s27 = scalar_lea.sflag [#allocation3], %s175_s28 }
  0x24   : > { %s523_s26 = sshll.u32 %s185_s10, 3  ;;  %s856_s4 = smov 128  }
  0x25   : > { %s187_s15 = scalar_lea.hbm %s1097_s0, %s523_s26  ;;  %s857_s20 = smov 8  }
  0x26   : > { %s188_s17 = sshll.u32 %s187_s15, 4  ;;  %p199_p4 = pnand %p524_p5, %p198_p6  ;;  %s189_s17 = int_to_ptr.hbm [resolvable:$true] %s188_s17 }
  0x27   : > { %603 = dma.hbm_to_vmem [thread:$0]  (!%p997_p3), %s189_s17, 768, %s191_s8, %s176_s27, %s856_s4, %s856_s4, %s857_s20  }
  0x28   : > { %202 = sbr.rel (%p199_p4) target bundleno = 358 (0x166), region = 32  ;;  %s204_s5 = sand.u32 (!%p199_p4), 1, %s830_s16  }
  0x29   : > { %s594_s6 = smul.u32 (!%p199_p4), 48, %s204_s5  ;;  %s205_s24 = scalar_lea.sflag (!%p199_p4), [#allocation3], %s204_s5 }
  0x2b   : > { %s208_s7 = scalar_lea.vmem (!%p199_p4), [#allocation2], %s594_s6 }
  0x2d   : > { %805 = dma.done.wait (%p965_p7), %s205_s24, 768  }
  0x2e   : > { %807 = vsyncadd (%p965_p7), %s205_s24, 4294966528  ;;  %v250_v0 = vld [vmem:[%s208_s7 + $0x20] sm:$0xff]  ;;  %v251_v1 = vld [vmem:[%s208_s7 + $0x28] sm:$0xff]  ;;  %vm269_vm0 = vcmask 392192   ;;  %s234_s26 = sand.u32 1, %s818_s13   ;;  %s595_s15 = smul.u32 12, %s842_s19 }
  0x2f   : > { %v248_v2 = vld [vmem:[%s208_s7 + $0x10] sm:$0xff]  ;;  %v254_v3 = vpack.c.bf16 %v251_v1, %v250_v0  ;;  %v249_v4 = vld [vmem:[%s208_s7 + $0x18] sm:$0xff]  ;;  %v246_v7 = vld [vmem:[%s208_s7] sm:$0xff]  ;;  %s525_s9 = sshll.u32 %s234_s26, 5  ;;  %s569_s28 = sshll.u32 %s838_s18, 2 }
  0x30   : > { %v582_v5 = vld [vmem:[%s1099_s2 + $0x38] sm:$0xff]  ;;  %v253_v6 = vpack.c.bf16 %v249_v4, %v248_v2  ;;  %v581_v9 = vld [vmem:[%s1099_s2 + $0x30] sm:$0xff]  ;;  %v580_v11 = vld [vmem:[%s1099_s2 + $0x28] sm:$0xff]  ;;  %s236_s11 = scalar_lea.vmem [#allocation5], %s525_s9  ;;  %s402_s23 = sadd.s32 %s595_s15, %s569_s28 }
  0x31   : > { %281 = vmatpush.bf16.msra.mxu0 %v254_v3  ;;  %v247_v8 = vld [vmem:[%s208_s7 + $0x8] sm:$0xff]  ;;  %361 = vmatpush.bf16.msra.mxu1 %v582_v5  ;;  %v573_v12 = vld [vmem:[%s1098_s1] sm:$0xff]  ;;  %v577_v16 = vld [vmem:[%s1099_s2 + $0x10] sm:$0xff]  ;;  %s570_s8 = sshll.u32 %s402_s23, 3  ;;  %s405_s5 = sshll.u32 %s236_s11, 4  ;;  %s406_s5 = int_to_ptr.vmem [resolvable:$true] %s405_s5 }
  0x32   : > { %583 = vmatpush.bf16.msra.mxu2 %v582_v5  ;;  %v252_v10 = vpack.c.bf16 %v247_v8, %v246_v7  ;;  %v579_v13 = vld [vmem:[%s1099_s2 + $0x20] sm:$0xff]  ;;  %v578_v14 = vld [vmem:[%s1099_s2 + $0x18] sm:$0xff]  ;;  %v574_v15 = vld [vmem:[%s1098_s1 + $0x8] sm:$0xff]  ;;  %s404_s4 = scalar_lea.hbm %s1100_s3, %s570_s8  ;;  %s389_s24 = scalar_lea.sflag [#allocation4], %s234_s26 }
  0x33   : > { %v576_v17 = vld [vmem:[%s1099_s2 + $0x8] sm:$0xff]  ;;  %v575_v18 = vld [vmem:[%s1099_s2] sm:$0xff]  ;;  %s407_s6 = sshll.u32 %s404_s4, 4  ;;  %s752_s17 = scalar_lea.hbm %s1100_s3, 192  ;;  %s408_s6 = int_to_ptr.hbm [resolvable:$true] %s407_s6 }
  0x34   : > { %s746_s19 = sshra.s32 %s408_s6, 4  ;;  %s747_s19 = int_to_ptr.hbm [resolvable:$true] %s746_s19 }
  0x35   : > { %282 = vmatpush.bf16.msra.mxu0 %v253_v6  ;;  %362 = vmatpush.bf16.msra.mxu1 %v581_v9  ;;  %s748_s18 = scalar_lea.hbm %s747_s19, 32  ;;  %p753_p10 = scmp.lt.s32.totalorder %s747_s19, %s1100_s3 }
  0x36   : > { %584 = vmatpush.bf16.msra.mxu2 %v581_v9  ;;  %p749_p7 = scmp.ne.s32.totalorder %s747_s19, %s748_s18  ;;  %p754_p11 = scmp.lt.s32.totalorder %s752_s17, %s748_s18 }
  0x38   : > { %p750_p8 = pnand %p749_p7, %p983_p0  ;;  %p755_p12 = por %p754_p11, %p753_p10 }
  0x39   : > { %283 = vmatpush.bf16.msra.mxu0 %v252_v10  ;;  %363 = vmatpush.bf16.msra.mxu1 %v580_v11 }
  0x3a   : > { %585 = vmatpush.bf16.msra.mxu2 %v580_v11  ;;  %p751_p9 = pneg %p750_p8 }
  0x3c   : > { %534 = vmatmul.msk.bf16.vlgmr.msra.gmra.mxu0 %vm269_vm0, %v573_v12  ;;  %p756_p13 = pnand %p755_p12, %p751_p9 }
  0x3d   : > { %364 = vmatpush.bf16.msra.mxu1 %v579_v13 }
  0x3e   : > { %586 = vmatpush.bf16.msra.mxu2 %v579_v13 }
  0x41   : > { %365 = vmatpush.bf16.msra.mxu1 %v578_v14 }
  0x42   : > { %587 = vmatpush.bf16.msra.mxu2 %v578_v14 }
  0x45   : > { %366 = vmatpush.bf16.msra.mxu1 %v577_v16 }
  0x46   : > { %588 = vmatpush.bf16.msra.mxu2 %v577_v16 }
  0x49   : > { %367 = vmatpush.bf16.msra.mxu1 %v576_v17 }
  0x4a   : > { %589 = vmatpush.bf16.msra.mxu2 %v576_v17 }
  0x4c   : > { %535 = vmatmul.msk.bf16.gmra.mxu0 %vm269_vm0, %v574_v15 }
  0x4d   : > { %368 = vmatpush.bf16.msra.mxu1 %v575_v18 }
  0x4e   : > { %590 = vmatpush.bf16.msra.mxu2 %v575_v18 }
  0xb9   : > { %v285_v19 = vpop.f32.mrf.mxu0 }
  0xc1   : > { %v287_v20 = vpop.f32.mrf.mxu0 }
  0xc2   : > { %v295_v21 = vpack.c.bf16 %v287_v20, %v285_v19 }
  0xc4   : > { %369 = vmatmul.bf16.vlgmr.msra.gmra.mxu1 %v295_v21 }
  0xc9   : > { %v290_v22 = vpop.f32.mrf.mxu0 }
  0xd1   : > { %v292_v23 = vpop.f32.mrf.mxu0 }
  0xd2   : > { %v296_v24 = vpack.c.bf16 %v292_v23, %v290_v22 }
  0xd4   : > { %374 = vmatmul.bf16.vlgmr.msra.gmra.mxu2 %v296_v24 }
 0x141   : > { %v370_v25 = vpop.f32.mrf.mxu1 }
 0x142   : > { %v380_v26 = vmul.f32 0.003921569, %v370_v25 }
 0x144   : > { %384 = vst [vmem:[%s236_s11] sm:$0xff] %v380_v26 }
 0x149   : > { %v372_v27 = vpop.f32.mrf.mxu1 }
 0x14a   : > { %v381_v28 = vmul.f32 0.003921569, %v372_v27 }
 0x14c   : > { %385 = vst [vmem:[%s236_s11 + $0x8] sm:$0xff] %v381_v28 }
 0x157   : > { %v375_v29 = vpop.f32.mrf.mxu2 }
 0x158   : > { %v382_v30 = vmul.f32 0.003921569, %v375_v29 }
 0x15a   : > { %386 = vst [vmem:[%s236_s11 + $0x10] sm:$0xff] %v382_v30 }
 0x15f   : > { %v377_v31 = vpop.f32.mrf.mxu2 }
 0x160   : > { %v383_v32 = vmul.f32 0.003921569, %v377_v31 }
 0x162   : > { %387 = vst [vmem:[%s236_s11 + $0x18] sm:$0xff] %v383_v32 }
 0x163   : > { %759 = shalt.err (!%p756_p13)
}
 0x164   : > { %s858_s26 = smov 128   ;;  %s859_s11 = smov 8  }
 0x165   : > { %598 = dma.vmem_to_hbm [thread:$0]  (%p983_p0), %s406_s5, 512, %s408_s6, %s389_s24, %s858_s26, %s858_s26, %s859_s11  }
 0x166 PF: > { %p609_p1 = scmp.ge.s32.totalorder %s854_s22, 2  ;;  %s422_s15 = sand.u32 1, %s814_s12  }
 0x167   : > { %s423_s28 = scalar_lea.sflag [#allocation4], %s422_s15 }
 0x168   : > { %p605_p3 = pnand %p609_p1, %p988_p2 }
 0x16a   : > { %p606_p5 = pneg %p605_p3 }
 0x16c   : > { %809 = dma.done.wait (%p606_p5), %s423_s28, 512  }
 0x16d   : > { %811 = vsyncadd (%p606_p5), %s423_s28, 4294966784  ;;  %s19_s22 = sadd.s32 1, %s854_s22   ;;  %s1116_s23 = sld [smem:[#allocation13_spill]] }
 0x16e   : > { %p16_p6 = scmp.ge.s32.totalorder %s19_s22, 8   ;;  %s1117_s29 = sld [smem:[#allocation8_spill]] }
 0x16f   : > { %s1118_s17 = sld [smem:[#allocation12_spill]]  ;;  %s1122_s12 = smov %s818_s13 }
 0x170   : > { %s1119_s18 = sld [smem:[#allocation9_spill]]  ;;  %s1123_s13 = smov %s822_s14 }
 0x171   : > { %s1120_s20 = sld [smem:[#allocation10_spill]]  ;;  %s1125_s15 = smov %s830_s16 }
 0x172   : > { %s1121_s8 = sld [smem:[#allocation11_spill]]  ;;  %s1127_s19 = smov %s850_s21 }
 0x173   : > { %s1124_s14 = smov %s1116_s23 }
 0x174   : > { %s1126_s16 = smov %s1117_s29  ;;  %18 = sbr.rel (!%p16_p6) target bundleno = 9 (0x9), region = 80 }
 0x178   : > { %s1128_s21 = smov %s1121_s8 }
 0x179   :  { %429 = vsyncpa [#allocation3], 1 }
 0x17a   :  { %431 = vsyncpa [#allocation3 + $0x1], 1 }
 0x17b   :  { %432 = vsyncpa [#allocation4], 1 }
 0x17c   :  { %434 = vsyncpa [#allocation4 + $0x1], 1 }

</bundles_post_ra>
